<compile_context>
chip_gen: v6e
topology: v6e:2x2x1
jax: 0.10.0
libtpu: 0.0.40
codegen_flags: <defaults>
</compile_context>

<pallas_src>
import functools

import jax
import jax.numpy as jnp
from jax.experimental import pallas as pl
from jax.experimental.pallas import tpu as pltpu


# ----------------------------- Pallas kernel -------------------------------

def fused_rgcn_kernel(a_ref, x_ref, w_ref, b_ref, o_ref, *, num_layers, num_relations, n):
    """All RGCN layers for ONE batch element (grid axis 0 = batch, 'parallel').

    a_ref: [1, R*N, N]        mean-normalized adjacency, relations stacked on rows (bf16)
    x_ref: [1, N, Dp]         input node features, feature dim zero-padded to Dp (bf16)
    w_ref: [L, (R+1)*Dp, Dp]  per-layer stacked+padded weights [W_root; W_1; ...; W_R] (bf16)
    b_ref: [L, 1, Dp]         per-layer bias, zero-padded (f32)
    o_ref: [1, N, Dp]         output features (f32)
    """
    a = a_ref[0]                                      # [R*N, N]   bf16
    x = x_ref[0]                                      # [N, Dp]    bf16
    cdt = x.dtype                                     # bf16 compute dtype for MXU inputs
    y = x.astype(jnp.float32)
    for l in range(num_layers):                       # L small -> unrolled
        # Aggregation for ALL relations in one MXU push: [R*N, N] @ [N, Dp] (f32 acc).
        h = jnp.dot(a, x, preferred_element_type=jnp.float32)        # [R*N, Dp]
        # feat = [x | A_1 x | ... | A_R x]: lane concat of full-128-lane, sublane-aligned
        # chunks (Dp multiple of 128 -> no masked stitching), feeding one fat
        # K=(R+1)*Dp weight matmul.
        feat = jnp.concatenate(
            [x] + [h[r * n:(r + 1) * n, :].astype(cdt) for r in range(num_relations)],
            axis=-1)                                                  # [N, (R+1)*Dp]
        y = jnp.dot(feat, w_ref[l], preferred_element_type=jnp.float32) + b_ref[l]
        if l != num_layers - 1:
            y = jnp.maximum(y, 0.0)                   # ReLU (not on last layer)
            # TODO(synk): training-mode nn.Dropout(0.3) not applied (identity in eval).
            x = y.astype(cdt)
    o_ref[0] = y.astype(o_ref.dtype)


def fused_graph_encoder(A3, Xp, w_pad, b_pad):
    """A3: [B, R*N, N] bf16, Xp: [B, N, Dp] bf16, w_pad: [L, (R+1)*Dp, Dp] bf16,
    b_pad: [L, 1, Dp] f32 -> [B, N, Dp] f32."""
    B, RN, N = A3.shape
    Dp = Xp.shape[-1]
    L, KD, _ = w_pad.shape
    R = RN // N

    kernel = functools.partial(fused_rgcn_kernel, num_layers=L, num_relations=R, n=N)
    # TODO(synk): at production N (or very large R*N) the per-batch dense adjacency must be
    # row-tiled (extra grid axis over destination-row tiles) or replaced by a sparse
    # gather/segment-sum aggregation to stay inside v7x's 64 MiB VMEM; fine at demo scale.
    return pl.pallas_call(
        kernel,
        out_shape=jax.ShapeDtypeStruct((B, N, Dp), jnp.float32),
        grid=(B,),
        in_specs=[
            pl.BlockSpec((1, RN, N), lambda b: (b, 0, 0)),    # per-batch adjacency
            pl.BlockSpec((1, N, Dp), lambda b: (b, 0, 0)),    # per-batch features
            pl.BlockSpec((L, KD, Dp), lambda b: (0, 0, 0)),   # weights (grid-invariant)
            pl.BlockSpec((L, 1, Dp), lambda b: (0, 0, 0)),    # biases (grid-invariant)
        ],
        out_specs=pl.BlockSpec((1, N, Dp), lambda b: (b, 0, 0)),
        compiler_params=pltpu.CompilerParams(
            dimension_semantics=("parallel",),                 # v7x: 2 TCs split the batch
            vmem_limit_bytes=32 * 1024 * 1024,                 # > v5e's 16 MiB scoped default
        ),
    )(A3, Xp, w_pad, b_pad)


# ------------------------------- JAX glue ----------------------------------

def build_norm_adjacency(edge_index, edge_type, num_relations, num_graph_nodes):
    """edge_index: [2, E] (row0=src, row1=dst); mean aggregation at dst per relation."""
    src, dst = edge_index[0], edge_index[1]
    A = jnp.zeros((num_relations, num_graph_nodes, num_graph_nodes), jnp.float32)
    A = A.at[edge_type, dst, src].add(1.0)
    deg = A.sum(axis=-1, keepdims=True)               # in-degree per relation [R, N, 1]
    return A / jnp.where(deg > 0, deg, 1.0)           # PyG aggr='mean'


def graph_encoder_forward(params, nodes, edges, types):
    """nodes: [B, N] int32; edges: [B, 2, E] int32; types: [B, E] int32 -> [B, N, D] f32."""
    B, N = nodes.shape
    emb = params["node_embedding"]
    D = emb.shape[1]
    w_all, b_all = params["w_all"], params["b_all"]   # [L,(R+1)*D,D], [L,1,D]
    L, RD1, _ = w_all.shape
    R = RD1 // D - 1
    Dp = -(-D // 128) * 128                           # pad feature dim to lane width

    # Embedding lookup (nn.Embedding) -- single XLA gather, plain-JAX glue.
    X = jnp.take(emb, nodes.reshape(-1), axis=0).reshape(B, N, D)
    Xp = jnp.pad(X, ((0, 0), (0, 0), (0, Dp - D))).astype(jnp.bfloat16)

    # Vectorized (vmapped) adjacency construction; kept per-batch (no block-diagonal fold).
    A = jax.vmap(build_norm_adjacency, in_axes=(0, 0, None, None))(edges, types, R, N)
    A3 = A.reshape(B, R * N, N).astype(jnp.bfloat16)  # [B, R*N, N]

    # Pad each of the (R+1) stacked DxD weight blocks into a Dp x Dp block (layout plumbing
    # done once per call; the kernel then sees clean 128-multiple K and N dims).
    w3 = w_all.reshape(L, R + 1, D, D)
    w_pad = jnp.zeros((L, R + 1, Dp, Dp), jnp.float32).at[:, :, :D, :D].set(w3)
    w_pad = w_pad.reshape(L, (R + 1) * Dp, Dp).astype(jnp.bfloat16)
    b_pad = jnp.pad(b_all, ((0, 0), (0, 0), (0, Dp - D)))          # f32, zero-padded

    out = fused_graph_encoder(A3, Xp, w_pad, b_pad)                # [B, N, Dp] f32
    return out[:, :, :D]


def init_params(key, vocab_size, embedding_size, num_relations, gnn_layers):
    keys = jax.random.split(key, 1 + 3 * gnn_layers)
    D, R = embedding_size, num_relations
    scale = 1.0 / jnp.sqrt(jnp.float32(D))
    # TODO(synk): pretrained embedding np.load(initilized_embedding) not reproduced; random init.
    node_embedding = jax.random.normal(keys[0], (vocab_size, D), jnp.float32) * 0.1
    w_all, b_all = [], []
    for l in range(gnn_layers):
        k_rel, k_root, k_b = keys[1 + 3 * l: 4 + 3 * l]
        w_rel = jax.random.normal(k_rel, (R, D, D), jnp.float32) * scale
        w_root = jax.random.normal(k_root, (D, D), jnp.float32) * scale
        bias = jax.random.normal(k_b, (1, D), jnp.float32) * 0.01
        # Stack [W_root; W_1; ...; W_R] so one K=(R+1)*D matmul does root + all relations.
        w_all.append(jnp.concatenate([w_root[None], w_rel], axis=0).reshape((R + 1) * D, D))
        b_all.append(bias)
    return {
        "node_embedding": node_embedding,
        "w_all": jnp.stack(w_all, axis=0),     # [L, (R+1)*D, D]  (unpadded, f32)
        "b_all": jnp.stack(b_all, axis=0),     # [L, 1, D]
    }


def _reference_forward(params, nodes, edges, types):
    """Pure-JAX reference matching the PyTorch module (per-batch / per-relation loops)."""
    B, N = nodes.shape
    D = params["node_embedding"].shape[1]
    L, RD1, _ = params["w_all"].shape
    R = RD1 // D - 1
    hp = jax.lax.Precision.HIGHEST
    outs = []
    for b in range(B):
        x = params["node_embedding"][nodes[b]]
        A = build_norm_adjacency(edges[b], types[b], R, N)
        for l in range(L):
            w = params["w_all"][l]
            w_root, w_rel = w[:D], w[D:].reshape(R, D, D)
            y = jnp.dot(x, w_root, precision=hp) + params["b_all"][l]
            for r in range(R):
                y = y + jnp.dot(jnp.dot(A[r], x, precision=hp), w_rel[r], precision=hp)
            x = jnp.maximum(y, 0.0) if l != L - 1 else y
        outs.append(x)
    return jnp.stack(outs, 0)


# --------------------------------- main -------------------------------------

if __name__ == "__main__":
    B = 2                 # batch_size
    N = 16                # graph nodes per sample
    VOCAB = 100           # embedding table rows (num_nodes in the module)
    D = 32                # embedding_size
    R = 4                 # num_relations
    LAYERS = 2            # gnn_layers
    E = 24                # edges per graph

    key = jax.random.PRNGKey(0)
    k_p, k_nodes, k_edges, k_types = jax.random.split(key, 4)

    params = init_params(k_p, VOCAB, D, R, LAYERS)
    nodes = jax.random.randint(k_nodes, (B, N), 0, VOCAB, dtype=jnp.int32)
    edges = jax.random.randint(k_edges, (B, 2, E), 0, N, dtype=jnp.int32)
    types = jax.random.randint(k_types, (B, E), 0, R, dtype=jnp.int32)

    fwd = jax.jit(graph_encoder_forward)
    out = jax.block_until_ready(fwd(params, nodes, edges, types))
    assert out.shape == (B, N, D) and out.dtype == jnp.float32

    # Kernel uses bf16 MXU inputs with f32 accumulation; reference is f32 HIGHEST,
    # so use a bf16-appropriate tolerance.
    ref = _reference_forward(params, nodes, edges, types)
    assert bool(jnp.allclose(out, ref, atol=3e-2, rtol=3e-2)), "mismatch vs pure-JAX reference"

    print("KERNEL_OK")
</pallas_src>

<mosaic_0001>
module attributes {stable_mosaic.version = 11 : i64} {
  func.func private @main(%arg0: i32) attributes {dimension_semantics = [#tpu.dimension_semantics<core_parallel>], iteration_bounds = array<i64: 2>, tpu.core_type = #tpu.core_type<sc_scalar_subcore>, window_params = []} {
    return
  }
}

module attributes {stable_mosaic.version = 11 : i64} {
  func.func private @main(%arg0: i32) attributes {dimension_semantics = [#tpu.dimension_semantics<core_parallel>], iteration_bounds = array<i64: 2>, tpu.core_type = #tpu.core_type<sc_scalar_subcore>, window_params = []} {
    return
  }
}

module attributes {stable_mosaic.version = 11 : i64} {
  func.func @fused_rgcn_kernel(%arg0: i32, %arg1: memref<1x64x16xbf16, #tpu.memory_space<vmem>>, %arg2: memref<1x16x128xbf16, #tpu.memory_space<vmem>>, %arg3: memref<2x640x128xbf16, #tpu.memory_space<vmem>>, %arg4: memref<2x1x128xf32, #tpu.memory_space<vmem>>, %arg5: memref<1x16x128xf32, #tpu.memory_space<vmem>>) attributes {dimension_semantics = [#tpu.dimension_semantics<parallel>], iteration_bounds = array<i64: 2>, scalar_prefetch = 0 : i64, scratch_operands = 0 : i64, tpu.core_type = #tpu.core_type<tc>, window_params = [{transform_indices = @transform_0, window_bounds = array<i64: 1, 64, 16>}, {transform_indices = @transform_1, window_bounds = array<i64: 1, 16, 128>}, {pipeline_mode = #tpu.pipeline_mode<synchronous>, transform_indices = @transform_2, window_bounds = array<i64: 2, 640, 128>}, {pipeline_mode = #tpu.pipeline_mode<synchronous>, transform_indices = @transform_3, window_bounds = array<i64: 2, 1, 128>}, {transform_indices = @transform_4, window_bounds = array<i64: 1, 16, 128>}]} {
    %c0 = arith.constant 0 : index
    %c0_0 = arith.constant 0 : index
    %c0_1 = arith.constant 0 : index
    %0 = vector.load %arg1[%c0, %c0_0, %c0_1] : memref<1x64x16xbf16, #tpu.memory_space<vmem>>, vector<1x64x16xbf16>
    %1 = vector.shape_cast %0 : vector<1x64x16xbf16> to vector<64x16xbf16>
    %c0_2 = arith.constant 0 : index
    %c0_3 = arith.constant 0 : index
    %c0_4 = arith.constant 0 : index
    %2 = vector.load %arg2[%c0_2, %c0_3, %c0_4] : memref<1x16x128xbf16, #tpu.memory_space<vmem>>, vector<1x16x128xbf16>
    %3 = vector.shape_cast %2 : vector<1x16x128xbf16> to vector<16x128xbf16>
    %cst = arith.constant dense<0.000000e+00> : vector<64x128xf32>
    %4 = tpu.matmul %1, %3, %cst {dimension_numbers = #tpu.dot_dimension_numbers<[1], [0], [0], [1], [0, 0, 1, 1], [], []>} : vector<64x16xbf16>, vector<16x128xbf16>, vector<64x128xf32> -> vector<64x128xf32>
    %5 = vector.extract_strided_slice %4 {offsets = [0, 0], sizes = [16, 128], strides = [1, 1]} : vector<64x128xf32> to vector<16x128xf32>
    %6 = arith.truncf %5 : vector<16x128xf32> to vector<16x128xbf16>
    %7 = vector.extract_strided_slice %4 {offsets = [16, 0], sizes = [16, 128], strides = [1, 1]} : vector<64x128xf32> to vector<16x128xf32>
    %8 = arith.truncf %7 : vector<16x128xf32> to vector<16x128xbf16>
    %9 = vector.extract_strided_slice %4 {offsets = [32, 0], sizes = [16, 128], strides = [1, 1]} : vector<64x128xf32> to vector<16x128xf32>
    %10 = arith.truncf %9 : vector<16x128xf32> to vector<16x128xbf16>
    %11 = vector.extract_strided_slice %4 {offsets = [48, 0], sizes = [16, 128], strides = [1, 1]} : vector<64x128xf32> to vector<16x128xf32>
    %12 = arith.truncf %11 : vector<16x128xf32> to vector<16x128xbf16>
    %13 = tpu.concatenate %3, %6, %8, %10, %12 in 1 : vector<16x128xbf16>, vector<16x128xbf16>, vector<16x128xbf16>, vector<16x128xbf16>, vector<16x128xbf16> -> vector<16x640xbf16>
    %c0_5 = arith.constant 0 : index
    %c0_6 = arith.constant 0 : index
    %c0_7 = arith.constant 0 : index
    %14 = vector.load %arg3[%c0_5, %c0_6, %c0_7] : memref<2x640x128xbf16, #tpu.memory_space<vmem>>, vector<1x640x128xbf16>
    %15 = vector.shape_cast %14 : vector<1x640x128xbf16> to vector<640x128xbf16>
    %cst_8 = arith.constant dense<0.000000e+00> : vector<16x128xf32>
    %16 = tpu.matmul %13, %15, %cst_8 {dimension_numbers = #tpu.dot_dimension_numbers<[1], [0], [0], [1], [0, 0, 1, 1], [], []>} : vector<16x640xbf16>, vector<640x128xbf16>, vector<16x128xf32> -> vector<16x128xf32>
    %c0_9 = arith.constant 0 : index
    %c0_10 = arith.constant 0 : index
    %c0_11 = arith.constant 0 : index
    %17 = vector.load %arg4[%c0_9, %c0_10, %c0_11] : memref<2x1x128xf32, #tpu.memory_space<vmem>>, vector<1x1x128xf32>
    %18 = vector.shape_cast %17 : vector<1x1x128xf32> to vector<1x128xf32>
    %19 = vector.broadcast %18 : vector<1x128xf32> to vector<16x128xf32>
    %20 = arith.addf %16, %19 : vector<16x128xf32>
    %cst_12 = arith.constant 0.000000e+00 : f32
    %21 = vector.broadcast %cst_12 : f32 to vector<16x128xf32>
    %22 = arith.maximumf %20, %21 : vector<16x128xf32>
    %23 = arith.truncf %22 : vector<16x128xf32> to vector<16x128xbf16>
    %cst_13 = arith.constant dense<0.000000e+00> : vector<64x128xf32>
    %24 = tpu.matmul %1, %23, %cst_13 {dimension_numbers = #tpu.dot_dimension_numbers<[1], [0], [0], [1], [0, 0, 1, 1], [], []>} : vector<64x16xbf16>, vector<16x128xbf16>, vector<64x128xf32> -> vector<64x128xf32>
    %25 = vector.extract_strided_slice %24 {offsets = [0, 0], sizes = [16, 128], strides = [1, 1]} : vector<64x128xf32> to vector<16x128xf32>
    %26 = arith.truncf %25 : vector<16x128xf32> to vector<16x128xbf16>
    %27 = vector.extract_strided_slice %24 {offsets = [16, 0], sizes = [16, 128], strides = [1, 1]} : vector<64x128xf32> to vector<16x128xf32>
    %28 = arith.truncf %27 : vector<16x128xf32> to vector<16x128xbf16>
    %29 = vector.extract_strided_slice %24 {offsets = [32, 0], sizes = [16, 128], strides = [1, 1]} : vector<64x128xf32> to vector<16x128xf32>
    %30 = arith.truncf %29 : vector<16x128xf32> to vector<16x128xbf16>
    %31 = vector.extract_strided_slice %24 {offsets = [48, 0], sizes = [16, 128], strides = [1, 1]} : vector<64x128xf32> to vector<16x128xf32>
    %32 = arith.truncf %31 : vector<16x128xf32> to vector<16x128xbf16>
    %33 = tpu.concatenate %23, %26, %28, %30, %32 in 1 : vector<16x128xbf16>, vector<16x128xbf16>, vector<16x128xbf16>, vector<16x128xbf16>, vector<16x128xbf16> -> vector<16x640xbf16>
    %c1 = arith.constant 1 : index
    %c0_14 = arith.constant 0 : index
    %c0_15 = arith.constant 0 : index
    %34 = vector.load %arg3[%c1, %c0_14, %c0_15] : memref<2x640x128xbf16, #tpu.memory_space<vmem>>, vector<1x640x128xbf16>
    %35 = vector.shape_cast %34 : vector<1x640x128xbf16> to vector<640x128xbf16>
    %cst_16 = arith.constant dense<0.000000e+00> : vector<16x128xf32>
    %36 = tpu.matmul %33, %35, %cst_16 {dimension_numbers = #tpu.dot_dimension_numbers<[1], [0], [0], [1], [0, 0, 1, 1], [], []>} : vector<16x640xbf16>, vector<640x128xbf16>, vector<16x128xf32> -> vector<16x128xf32>
    %c1_17 = arith.constant 1 : index
    %c0_18 = arith.constant 0 : index
    %c0_19 = arith.constant 0 : index
    %37 = vector.load %arg4[%c1_17, %c0_18, %c0_19] : memref<2x1x128xf32, #tpu.memory_space<vmem>>, vector<1x1x128xf32>
    %38 = vector.shape_cast %37 : vector<1x1x128xf32> to vector<1x128xf32>
    %39 = vector.broadcast %38 : vector<1x128xf32> to vector<16x128xf32>
    %40 = arith.addf %36, %39 : vector<16x128xf32>
    %c0_20 = arith.constant 0 : index
    %c0_21 = arith.constant 0 : index
    %c0_22 = arith.constant 0 : index
    %41 = vector.load %arg5[%c0_20, %c0_21, %c0_22] : memref<1x16x128xf32, #tpu.memory_space<vmem>>, vector<1x16x128xf32>
    %42 = vector.shape_cast %41 : vector<1x16x128xf32> to vector<16x128xf32>
    %43 = vector.shape_cast %40 : vector<16x128xf32> to vector<1x16x128xf32>
    tpu.vector_store %arg5[%c0_20, %c0_21, %c0_22], %43 {strides = array<i32>} : memref<1x16x128xf32, #tpu.memory_space<vmem>>, vector<1x16x128xf32>,
    return
  }
  func.func @transform_0(%arg0: i32) -> (i32, i32, i32) {
    %c0_i32 = arith.constant 0 : i32
    %c0_i32_0 = arith.constant 0 : i32
    %c0_i32_1 = arith.constant 0 : i32
    return %arg0, %c0_i32, %c0_i32_0 : i32, i32, i32
  }
  func.func @transform_1(%arg0: i32) -> (i32, i32, i32) {
    %c0_i32 = arith.constant 0 : i32
    %c0_i32_0 = arith.constant 0 : i32
    %c0_i32_1 = arith.constant 0 : i32
    return %arg0, %c0_i32, %c0_i32_0 : i32, i32, i32
  }
  func.func @transform_2(%arg0: i32) -> (i32, i32, i32) {
    %c0_i32 = arith.constant 0 : i32
    %c0_i32_0 = arith.constant 0 : i32
    %c0_i32_1 = arith.constant 0 : i32
    %c0_i32_2 = arith.constant 0 : i32
    return %c0_i32, %c0_i32_0, %c0_i32_1 : i32, i32, i32
  }
  func.func @transform_3(%arg0: i32) -> (i32, i32, i32) {
    %c0_i32 = arith.constant 0 : i32
    %c0_i32_0 = arith.constant 0 : i32
    %c0_i32_1 = arith.constant 0 : i32
    %c0_i32_2 = arith.constant 0 : i32
    return %c0_i32, %c0_i32_0, %c0_i32_1 : i32, i32, i32
  }
  func.func @transform_4(%arg0: i32) -> (i32, i32, i32) {
    %c0_i32 = arith.constant 0 : i32
    %c0_i32_0 = arith.constant 0 : i32
    %c0_i32_1 = arith.constant 0 : i32
    return %arg0, %c0_i32, %c0_i32_0 : i32, i32, i32
  }
}

</mosaic_0001>

<bundles_post_ra>
// kernel: graph_encoder_forward.1
= control target key start
LH: loop header
LB: loop body
LE: loop exit
PB: predicated region body
PF: predicated region fallthrough
CT: control target
= control target key end

     0   :  { %9 = vsyncpa [#allocation3], 0  ;;  %s2393_s0 = inlined_call_operand.vmem [shape: bf16[2,64,16], index: 0, kind: input, shape index: {}]   ;;  %s2394_s1 = inlined_call_operand.vmem [shape: bf16[2,16,128], index: 1, kind: input, shape index: {}]   ;;  %s2395_s2 = inlined_call_operand.vmem [shape: bf16[2,640,128], index: 2, kind: input, shape index: {}]   ;;  %s2396_s3 = inlined_call_operand.vmem [shape: f32[2,1,128], index: 3, kind: input, shape index: {}]   ;;  %s2397_s4 = inlined_call_operand.hbm [shape: f32[2,16,128], index: 4, kind: output, shape index: {}]  }
   0x1   :  { %11 = vsyncpa [#allocation3 + $0x1], 0  ;;  %s1988_s15 = smov 0   ;;  %s1990_s16 = smov 0  }
   0x2   :  { %s1992_s17 = smov 0   ;;  %s1994_s18 = smov 0  }
   0x3 LB: > { %s2009_s19 = sadd.s32 4294967295, %s1956_s18   ;;  %s1399_s20 = sadd.s32 4294967294, %s1956_s18   ;;  %s1956_s18 = sphi %s1994_s18, %s2403_s18   ;;  %s1952_s17 = sphi %s1992_s17, %s2402_s17   ;;  %s1948_s16 = sphi %s1990_s16, %s2401_s16   ;;  %s1944_s15 = sphi %s1988_s15, %s2400_s15  }
   0x4   : > { %s2013_s21 = sadd.s32 1, %s1956_s18   ;;  %s118_s22 = sadd.s32 1, %s1952_s17 }
   0x5   : > { %s115_s23 = ssub.s32 %s1956_s18, %s2013_s21  ;;  %p128_p0 = scmp.ne.s32.totalorder %s1952_s17, %s1948_s16 }
   0x6   : > { %p116_p1 = scmp.eq.s32.totalorder %s115_s23, 0  ;;  %p129_p2 = scmp.eq.s32.totalorder %s2009_s19, 1 }
   0x7   : > { %p134_p3 = scmp.ne.s32.totalorder %s1948_s16, %s1944_s15  ;;  %p135_p4 = scmp.eq.s32.totalorder %s1399_s20, 1 }
   0x8   : > { %s2024_s24 = scalar_select %p116_p1, %s1952_s17, %s118_s22  }
   0x9   : > { %p2026_p5 = por %p129_p2, %p128_p0  ;;  %p2030_p6 = por %p135_p4, %p134_p3 }
   0xa   : > { %p1402_p7 = scmp.ge.s32.totalorder %s1956_s18, 1  ;;  %p175_p8 = scmp.lt.s32.totalorder %s1956_s18, 3 }
   0xc   : > { %p176_p9 = pnand %p1402_p7, %p175_p8 }
   0xd   : > { %p206_p10 = scmp.lt.s32.totalorder (!%p176_p9), %s2009_s19, 1  ;;  %s203_s30 = sand.u32 (!%p176_p9), 1, %s1948_s16  }
   0xe   : > { %179 = sbr.rel (%p176_p9) target bundleno = 916 (0x394), region = 36  ;;  %s1403_s5 = sshll.u32 (!%p176_p9), %s203_s30, 4 }
   0xf   : > { %s205_s6 = scalar_lea.vmem (!%p176_p9), [#allocation2], %s1403_s5  ;;  %s1591_s9 = sshll.u32 (!%p176_p9), %s2009_s19, 8 }
  0x10   : > { %s1325_s7 = sshll.u32 (!%p176_p9), %s205_s6, 4  ;;  %s2351_s12 = scalar_lea.hbm (!%p176_p9), %s2397_s4, %s1591_s9  ;;  %s2346_s7 = int_to_ptr.vmem [resolvable:$true] %s1325_s7 }
  0x11   : > { %s2353_s13 = scalar_lea.sflag (!%p176_p9), [#allocation3], %s203_s30  ;;  %s1960_s14 = smov (!%p176_p9), [#allocation2]  }
  0x13   : > { %s207_s27 = scalar_select %p206_p10, %s2009_s19, 1  ;;  %v1816_v0 = vld [vmem:[%s2395_s2 + $0x78] sm:$0xff]   ;;  %vm253_vm0 = vcmask 130048   ;;  %v1818_v6 = vld [vmem:[%s2395_s2 + $0x70] sm:$0xff]   ;;  %v1820_v8 = vld [vmem:[%s2395_s2 + $0x68] sm:$0xff]   ;;  %v1958_v34 = vmov 0.0  }
  0x14   : > { %v1817_v3 = vld [vmem:[%s2395_s2 + $0x38] sm:$0xff]   ;;  %v1819_v7 = vld [vmem:[%s2395_s2 + $0x30] sm:$0xff]   ;;  %v1821_v12 = vld [vmem:[%s2395_s2 + $0x28] sm:$0xff]   ;;  %vm1959_vm1 = vmmov 0   ;;  %s1896_s19 = scalar_lea.vmem %s2346_s7, 256 }
  0x15   : > { %s1589_s28 = sshll.u32 %s207_s27, 5  ;;  %s1590_s29 = sshll.u32 %s207_s27, 3  ;;  %v1822_v9 = vld [vmem:[%s2395_s2 + $0xf8] sm:$0xff]   ;;  %v1826_v13 = vld [vmem:[%s2395_s2 + $0xf0] sm:$0xff]   ;;  %v1824_v15 = vld [vmem:[%s2395_s2 + $0x60] sm:$0xff]  }
  0x16   : > { %s210_s8 = scalar_lea.vmem %s2393_s0, %s1589_s28  ;;  %s215_s11 = scalar_lea.vmem %s2394_s1, %s1590_s29  ;;  %v1823_v10 = vld [vmem:[%s2395_s2 + $0xb8] sm:$0xff]   ;;  %1619 = vmatprep.subr.bf16.mxu0 %v1822_v9  ;;  %v1827_v14 = vld [vmem:[%s2395_s2 + $0xb0] sm:$0xff]   ;;  %v1825_v16 = vld [vmem:[%s2395_s2 + $0x20] sm:$0xff]  }
  0x17   : > { %v2047_v1 = vld [vmem:[%s215_s11] sm:$0xff]   ;;  %v2055_v4 = vld [vmem:[%s210_s8 + $0x8] sm:$0xff]   ;;  %v2060_v5 = vld [vmem:[%s210_s8 + $0x10] sm:$0xff]   ;;  %1620 = vmatpush3.bf16.msra.mxu0 %v1823_v10  ;;  %p1897_p11 = scmp.ne.s32.totalorder %s2346_s7, %s1896_s19 }
  0x18   : > { %v2049_v2 = vld [vmem:[%s210_s8] sm:$0xff]   ;;  %1708 = vmatprep.subr.bf16.mxu1 %v2047_v1  ;;  %v2081_v11 = vld [vmem:[%s210_s8 + $0x18] sm:$0xff]   ;;  %1621 = vmatprep.subr.bf16.mxu0 %v1826_v13  ;;  %v1830_v17 = vld [vmem:[%s2395_s2 + $0xe8] sm:$0xff]   ;;  %s1900_s8 = sshll.u32 %s1960_s14, 4  ;;  %s1901_s8 = int_to_ptr.vmem [resolvable:$false] %s1900_s8 }
  0x19   : > { %1709 = vmatpush3.bf16.msra.mxu1 %v2047_v1  ;;  %1710 = vmatprep.mubr.msk.bf16.mxu1 %vm253_vm0, %v2049_v2  ;;  %v1831_v18 = vld [vmem:[%s2395_s2 + $0xa8] sm:$0xff]   ;;  %v1828_v19 = vld [vmem:[%s2395_s2 + $0x58] sm:$0xff]   ;;  %v1832_v21 = vld [vmem:[%s2395_s2 + $0x50] sm:$0xff]   ;;  %p1898_p12 = pnand %p1897_p11, %p2026_p5  ;;  %s1902_s20 = scalar_lea.vmem %s1901_s8, 512 }
  0x1a   : > { %1597 = vmatprep.subr.bf16.mxu1 %v1816_v0  ;;  %v1829_v20 = vld [vmem:[%s2395_s2 + $0x18] sm:$0xff]   ;;  %v1834_v22 = vld [vmem:[%s2395_s2 + $0xe0] sm:$0xff]   ;;  %v1833_v24 = vld [vmem:[%s2395_s2 + $0x10] sm:$0xff]   ;;  %p1903_p0 = scmp.lt.s32.totalorder %s2346_s7, %s1901_s8  ;;  %p1904_p1 = scmp.lt.s32.totalorder %s1902_s20, %s1896_s19 }
  0x1b   : > { %1622 = vmatpush3.bf16.msra.mxu0 %v1827_v14  ;;  %v1835_v23 = vld [vmem:[%s2395_s2 + $0xa0] sm:$0xff]   ;;  %v1836_v25 = vld [vmem:[%s2395_s2 + $0x48] sm:$0xff]   ;;  %v1838_v27 = vld [vmem:[%s2395_s2 + $0xd8] sm:$0xff]   ;;  %p1899_p13 = pneg %p1898_p12 }
  0x1c   : > { %1711 = vmatmul.mubr.msk.bf16.vlgmr.msra.gmra.mxu1 %vm253_vm0, %v2055_v4  ;;  %1623 = vmatprep.subr.bf16.mxu0 %v1830_v17  ;;  %v1837_v26 = vld [vmem:[%s2395_s2 + $0x8] sm:$0xff]   ;;  %v1839_v28 = vld [vmem:[%s2395_s2 + $0x98] sm:$0xff]   ;;  %v1840_v29 = vld [vmem:[%s2395_s2 + $0x40] sm:$0xff]   ;;  %p1905_p2 = por %p1904_p1, %p1903_p0 }
  0x1d   : > { %1714 = vmatprep.mubr.msk.bf16.mxu1 %vm253_vm0, %v2060_v5  ;;  %1598 = vmatpush3.bf16.msra.mxu1 %v1817_v3  ;;  %v1841_v30 = vld [vmem:[%s2395_s2] sm:$0xff]   ;;  %v1842_v31 = vld [vmem:[%s2395_s2 + $0xd0] sm:$0xff]   ;;  %v1844_v33 = vld [vmem:[%s2395_s2 + $0xc8] sm:$0xff]  }
  0x1e   : > { %1599 = vmatprep.subr.bf16.mxu1 %v1818_v6  ;;  %v1843_v32 = vld [vmem:[%s2395_s2 + $0x90] sm:$0xff]   ;;  %v1846_v35 = vld [vmem:[%s2395_s2 + $0x88] sm:$0xff]   ;;  %v1847_v36 = vld [vmem:[%s2395_s2 + $0xc0] sm:$0xff]   ;;  %p1906_p3 = pnand %p1905_p2, %p1899_p13 }
  0x1f   : > { %1624 = vmatpush3.bf16.msra.mxu0 %v1831_v18  ;;  %v1849_v37 = vld [vmem:[%s2395_s2 + $0x80] sm:$0xff]   ;;  %v1845_v43 = vld [vmem:[%s2395_s2 + $0x138] sm:$0xff]   ;;  %v1848_v46 = vld [vmem:[%s2395_s2 + $0x130] sm:$0xff]  }
  0x20   : > { %1625 = vmatprep.subr.bf16.mxu0 %v1834_v22  ;;  %v1850_v50 = vld [vmem:[%s2395_s2 + $0x128] sm:$0xff]   ;;  %v1851_v52 = vld [vmem:[%s2395_s2 + $0x120] sm:$0xff]   ;;  %v1852_v53 = vld [vmem:[%s2395_s2 + $0x118] sm:$0xff]  }
  0x21   : > { %1600 = vmatpush3.bf16.msra.mxu1 %v1819_v7  ;;  %v1853_v54 = vld [vmem:[%s2395_s2 + $0x110] sm:$0xff]   ;;  %v1854_v55 = vld [vmem:[%s2395_s2 + $0x108] sm:$0xff]   ;;  %v1855_v56 = vld [vmem:[%s2395_s2 + $0x100] sm:$0xff]  }
  0x22   : > { %1601 = vmatprep.subr.bf16.mxu1 %v1820_v8  ;;  %v1862_v58 = vld [vmem:[%s2395_s2 + $0x238] sm:$0xff]   ;;  %v1866_v60 = vld [vmem:[%s2395_s2 + $0x230] sm:$0xff]   ;;  %v1870_v62 = vld [vmem:[%s2395_s2 + $0x228] sm:$0xff]  }
  0x23   : > { %1626 = vmatpush3.bf16.msra.mxu0 %v1835_v23  ;;  %v1863_v59 = vld [vmem:[%s2395_s2 + $0x1f8] sm:$0xff]   ;;  %v1867_v61 = vld [vmem:[%s2395_s2 + $0x1f0] sm:$0xff]   ;;  %v1871_v63 = vld [vmem:[%s2395_s2 + $0x1e8] sm:$0xff]  }
  0x24   : > { %1715 = vmatmul.mubr.msk.bf16.gmra.mxu1 %vm253_vm0, %v2081_v11  ;;  %1627 = vmatprep.subr.bf16.mxu0 %v1838_v27  ;;  %v1874_v0 = vld [vmem:[%s2395_s2 + $0x220] sm:$0xff]  }
  0x25   : > { %1602 = vmatpush3.bf16.msra.mxu1 %v1821_v12  ;;  %v1417_v13 = vld [vmem:[%s2396_s3] ss:$0 sm:$0xff] }
  0x26   : > { %1603 = vmatprep.subr.bf16.mxu1 %v1824_v15 }
  0x27   : > { %1628 = vmatpush3.bf16.msra.mxu0 %v1839_v28 }
  0x28   : > { %1629 = vmatprep.subr.bf16.mxu0 %v1842_v31  ;;  %v1856_v31 = vld [vmem:[%s2395_s2 + $0x1b8] sm:$0xff]  }
  0x29   : > { %1604 = vmatpush3.bf16.msra.mxu1 %v1825_v16 }
  0x2a   : > { %1605 = vmatprep.subr.bf16.mxu1 %v1828_v19 }
  0x2b   : > { %1630 = vmatpush3.bf16.msra.mxu0 %v1843_v32  ;;  %v1857_v32 = vld [vmem:[%s2395_s2 + $0x178] sm:$0xff]  }
  0x2c   : > { %1631 = vmatprep.subr.bf16.mxu0 %v1844_v33  ;;  %v1858_v33 = vld [vmem:[%s2395_s2 + $0x1b0] sm:$0xff]  }
  0x2d   : > { %1606 = vmatpush3.bf16.msra.mxu1 %v1829_v20 }
  0x2e   : > { %1607 = vmatprep.subr.bf16.mxu1 %v1832_v21 }
  0x2f   : > { %1632 = vmatpush3.bf16.msra.mxu0 %v1846_v35  ;;  %v1859_v35 = vld [vmem:[%s2395_s2 + $0x170] sm:$0xff]  }
  0x30   : > { %1633 = vmatprep.subr.bf16.mxu0 %v1847_v36  ;;  %v1860_v36 = vld [vmem:[%s2395_s2 + $0x1a8] sm:$0xff]  }
  0x31   : > { %1608 = vmatpush3.bf16.msra.mxu1 %v1833_v24 }
  0x32   : > { %1609 = vmatprep.subr.bf16.mxu1 %v1836_v25 }
  0x33   : > { %1634 = vmatpush3.bf16.msra.mxu0 %v1849_v37  ;;  %v1861_v37 = vld [vmem:[%s2395_s2 + $0x168] sm:$0xff]  }
  0x35   : > { %1610 = vmatpush3.bf16.msra.mxu1 %v1837_v26 }
  0x36   : > { %1611 = vmatprep.subr.bf16.mxu1 %v1840_v29 }
  0x39   : > { %1612 = vmatpush3.bf16.msra.mxu1 %v1841_v30 }
  0x3a   : > { %1718 = vmatprep.subr.bf16.mxu1 %v1958_v34 }
  0xdc   : > { %v1712_v38 = vpop.f32.mrf.mxu1 }
  0xde   : > { %v300_v39 = vpop.f32.mrf.mxu1 }
  0xe0   : > { %v1713_v40 = vpop.f32.mrf.mxu1 }
  0xe1   : > { %v332_v51 = vpack.c.bf16 %v1713_v40, %v1712_v38  ;;  %v1868_v38 = vld [vmem:[%s2395_s2 + $0x198] sm:$0xff]   ;;  %v1873_v40 = vld [vmem:[%s2395_s2 + $0x150] sm:$0xff]  }
  0xe2   : > { %v303_v41 = vpop.f32.mrf.mxu1 }
  0xe3   : > { %v331_v42 = vpack.c.bf16 %v303_v41, %v300_v39  ;;  %v1869_v39 = vld [vmem:[%s2395_s2 + $0x158] sm:$0xff]   ;;  %v1876_v41 = vld [vmem:[%s2395_s2 + $0x188] sm:$0xff]  }
  0xe4   : > { %v1716_v44 = vpop.f32.mrf.mxu1 }
  0xe5   : > { %694 = vmatprep.mubr.bf16.mxu1 %v331_v42  ;;  %v1877_v42 = vld [vmem:[%s2395_s2 + $0x148] sm:$0xff]  }
  0xe6   : > { %v316_v45 = vpop.f32.mrf.mxu1  ;;  %695 = vmatmul.mubr.bf16.vlgmr.msra.gmra.mxu1 %v2047_v1  ;;  %v1875_v1 = vld [vmem:[%s2395_s2 + $0x1e0] sm:$0xff]  }
  0xe7   : > { %1719 = vmatpush3.bf16.msra.mxu1 %v1845_v43  ;;  %1734 = vmatprep.mubr.msk.bf16.mxu1 %vm1959_vm1, %v1958_v34  ;;  %v1878_v43 = vld [vmem:[%s2395_s2 + $0x218] sm:$0xff]  }
  0xe8   : > { %v1717_v47 = vpop.f32.mrf.mxu1  ;;  %1720 = vmatprep.subr.bf16.mxu1 %v1958_v34 }
  0xe9   : > { %v334_v57 = vpack.c.bf16 %v1717_v47, %v1716_v44  ;;  %v1879_v44 = vld [vmem:[%s2395_s2 + $0x1d8] sm:$0xff]   ;;  %v1882_v47 = vld [vmem:[%s2395_s2 + $0x210] sm:$0xff]  }
  0xea   : > { %v319_v48 = vpop.f32.mrf.mxu1 }
  0xeb   : > { %1721 = vmatpush3.bf16.msra.mxu1 %v1848_v46  ;;  %v333_v49 = vpack.c.bf16 %v319_v48, %v316_v45  ;;  %v1880_v45 = vld [vmem:[%s2395_s2 + $0x180] sm:$0xff]   ;;  %v1883_v48 = vld [vmem:[%s2395_s2 + $0x1d0] sm:$0xff]  }
  0xec   : > { %1722 = vmatprep.subr.bf16.mxu1 %v1958_v34  ;;  %v1881_v46 = vld [vmem:[%s2395_s2 + $0x140] sm:$0xff]  }
  0xed   : > { %735 = vmatprep.mubr.bf16.mxu0 %v333_v49  ;;  %v1884_v49 = vld [vmem:[%s2395_s2 + $0x208] sm:$0xff]  }
  0xee   : > { %736 = vmatmul.mubr.bf16.vlgmr.msra.gmra.mxu0 %v332_v51  ;;  %v1887_v51 = vld [vmem:[%s2395_s2 + $0x200] sm:$0xff]  }
  0xef   : > { %1723 = vmatpush3.bf16.msra.mxu1 %v1850_v50  ;;  %1740 = vmatprep.mubr.msk.bf16.mxu0 %vm253_vm0, %v2049_v2  ;;  %v1886_v50 = vld [vmem:[%s2395_s2 + $0x1c8] sm:$0xff]  }
  0xf0   : > { %1724 = vmatprep.subr.bf16.mxu1 %v1958_v34 }
  0xf3   : > { %1725 = vmatpush3.bf16.msra.mxu1 %v1851_v52  ;;  %v1889_v52 = vld [vmem:[%s2395_s2 + $0x1c0] sm:$0xff]  }
  0xf4   : > { %1726 = vmatprep.subr.bf16.mxu1 %v1958_v34 }
  0xf7   : > { %1727 = vmatpush3.bf16.msra.mxu1 %v1852_v53 }
  0xf8   : > { %1728 = vmatprep.subr.bf16.mxu1 %v1958_v34 }
  0xfb   : > { %1729 = vmatpush3.bf16.msra.mxu1 %v1853_v54 }
  0xfc   : > { %1730 = vmatprep.subr.bf16.mxu1 %v1958_v34 }
  0xff   : > { %1731 = vmatpush3.bf16.msra.mxu1 %v1854_v55 }
 0x100   : > { %1732 = vmatprep.subr.bf16.mxu1 %v1958_v34 }
 0x103   : > { %1733 = vmatpush3.bf16.msra.mxu1 %v1855_v56 }
 0x104   : > { %1677 = vmatprep.subr.bf16.mxu1 %v1862_v58  ;;  %v1885_v58 = vld [vmem:[%s2395_s2 + $0x278] sm:$0xff]  }
 0x106   : > { %1735 = vmatmul.mubr.bf16.vlgmr.msra.gmra.mxu1 %v334_v57 }
 0x107   : > { %1678 = vmatpush3.bf16.msra.mxu1 %v1863_v59 }
 0x108   : > { %1679 = vmatprep.subr.bf16.mxu1 %v1866_v60 }
 0x10b   : > { %1680 = vmatpush3.bf16.msra.mxu1 %v1867_v61  ;;  %v1888_v61 = vld [vmem:[%s2395_s2 + $0x270] sm:$0xff]  }
 0x10c   : > { %1681 = vmatprep.subr.bf16.mxu1 %v1870_v62 }
 0x10f   : > { %1682 = vmatpush3.bf16.msra.mxu1 %v1871_v63 }
 0x110   : > { %1683 = vmatprep.subr.bf16.mxu1 %v1874_v0 }
 0x113   : > { %1684 = vmatpush3.bf16.msra.mxu1 %v1875_v1  ;;  %v1890_v1 = vld [vmem:[%s2395_s2 + $0x268] sm:$0xff]  }
 0x114   : > { %1685 = vmatprep.subr.bf16.mxu1 %v1878_v43 }
 0x117   : > { %1686 = vmatpush3.bf16.msra.mxu1 %v1879_v44 }
 0x118   : > { %1687 = vmatprep.subr.bf16.mxu1 %v1882_v47 }
 0x11b   : > { %1688 = vmatpush3.bf16.msra.mxu1 %v1883_v48 }
 0x11c   : > { %1689 = vmatprep.subr.bf16.mxu1 %v1884_v49 }
 0x11f   : > { %1690 = vmatpush3.bf16.msra.mxu1 %v1886_v50 }
 0x120   : > { %1691 = vmatprep.subr.bf16.mxu1 %v1887_v51 }
 0x123   : > { %1692 = vmatpush3.bf16.msra.mxu1 %v1889_v52 }
 0x1a6   : > { %v1613_v2 = vpop.f32.mrf.mxu1 }
 0x1a8   : > { %v1614_v6 = vpop.f32.mrf.mxu1 }
 0x1a9   : > { %v1615_v12 = vadd.f32 %v1614_v6, %v1613_v2  ;;  %v1892_v6 = vld [vmem:[%s2395_s2 + $0x258] sm:$0xff]  }
 0x1aa   : > { %v1616_v8 = vpop.f32.mrf.mxu1 }
 0x1ab   : > { %v697_v17 = vadd.f32 %v1615_v12, %v1417_v13 }
 0x1ac   : > { %v1617_v10 = vpop.f32.mrf.mxu1 }
 0x1ad   : > { %v1618_v15 = vadd.f32 %v1617_v10, %v1616_v8  ;;  %v1894_v8 = vld [vmem:[%s2395_s2 + $0x248] sm:$0xff]  }
 0x1ae   : > { %v1635_v3 = vpop.f32.mrf.mxu0 }
 0x1af   : > { %v700_v20 = vadd.f32 %v1618_v15, %v1417_v13 }
 0x1b0   : > { %v1636_v7 = vpop.f32.mrf.mxu0 }
 0x1b1   : > { %v1637_v16 = vadd.f32 %v1636_v7, %v1635_v3  ;;  %v1891_v3 = vld [vmem:[%s2395_s2 + $0x260] sm:$0xff]   ;;  %v1893_v7 = vld [vmem:[%s2395_s2 + $0x250] sm:$0xff]  }
 0x1b2   : > { %v1638_v9 = vpop.f32.mrf.mxu0 }
 0x1b3   : > { %v738_v21 = vadd.f32 %v1637_v16, %v697_v17 }
 0x1b4   : > { %v1639_v14 = vpop.f32.mrf.mxu0 }
 0x1b5   : > { %v1640_v18 = vadd.f32 %v1639_v14, %v1638_v9  ;;  %v1895_v9 = vld [vmem:[%s2395_s2 + $0x240] sm:$0xff]  }
 0x1b7   : > { %v741_v24 = vadd.f32 %v1640_v18, %v700_v20 }
 0x1c6   : > { %v778_v19 = vpop.f32.mrf.mxu1 }
 0x1c7   : > { %v779_v23 = vadd.f32 %v778_v19, %v738_v21  ;;  %v1543_v19 = vld [vmem:[%s2396_s3 + $0x1] ss:$0 sm:$0xff] }
 0x1c8   : > { %v1736_v22 = vpop.f32.mrf.mxu1 }
 0x1c9   : > { %v785_v28 = vmax.f32 %v779_v23, 0.0 }
 0x1ca   : > { %v781_v25 = vpop.f32.mrf.mxu1 }
 0x1cb   : > { %v782_v26 = vadd.f32 %v781_v25, %v741_v24 }
 0x1cc   : > { %v1737_v27 = vpop.f32.mrf.mxu1 }
 0x1cd   : > { %v786_v29 = vmax.f32 %v782_v26, 0.0 }
 0x1cf   : > { %v2224_v30 = vpack.c.bf16 %v786_v29, %v785_v28 }
 0x1d1   : > { %1738 = vmatprep.subr.bf16.mxu0 %v2224_v30 }
 0x1d2   : > { %1739 = vmatpush3.bf16.msra.mxu0 %v2224_v30 }
 0x1d3   : > { %1655 = vmatprep.subr.bf16.mxu0 %v1856_v31 }
 0x1d5   : > { %1741 = vmatmul.mubr.msk.bf16.vlgmr.msra.gmra.mxu0 %vm253_vm0, %v2055_v4  ;;  %v1864_v4 = vld [vmem:[%s2395_s2 + $0x1a0] sm:$0xff]  }
 0x1d6   : > { %1744 = vmatprep.mubr.msk.bf16.mxu0 %vm253_vm0, %v2060_v5  ;;  %1656 = vmatpush3.bf16.msra.mxu0 %v1857_v32  ;;  %v1865_v5 = vld [vmem:[%s2395_s2 + $0x160] sm:$0xff]  }
 0x1d7   : > { %1657 = vmatprep.subr.bf16.mxu0 %v1858_v33 }
 0x1da   : > { %1658 = vmatpush3.bf16.msra.mxu0 %v1859_v35 }
 0x1db   : > { %1659 = vmatprep.subr.bf16.mxu0 %v1860_v36 }
 0x1dd   : > { %1745 = vmatmul.mubr.msk.bf16.gmra.mxu0 %vm253_vm0, %v2081_v11  ;;  %v1872_v11 = vld [vmem:[%s2395_s2 + $0x190] sm:$0xff]  }
 0x1de   : > { %1660 = vmatpush3.bf16.msra.mxu0 %v1861_v37 }
 0x1df   : > { %1661 = vmatprep.subr.bf16.mxu0 %v1864_v4 }
 0x1e2   : > { %1662 = vmatpush3.bf16.msra.mxu0 %v1865_v5 }
 0x1e3   : > { %1663 = vmatprep.subr.bf16.mxu0 %v1868_v38 }
 0x1e6   : > { %1664 = vmatpush3.bf16.msra.mxu0 %v1869_v39 }
 0x1e7   : > { %1665 = vmatprep.subr.bf16.mxu0 %v1872_v11 }
 0x1ea   : > { %1666 = vmatpush3.bf16.msra.mxu0 %v1873_v40 }
 0x1eb   : > { %1667 = vmatprep.subr.bf16.mxu0 %v1876_v41 }
 0x1ee   : > { %1668 = vmatpush3.bf16.msra.mxu0 %v1877_v42 }
 0x1ef   : > { %1669 = vmatprep.subr.bf16.mxu0 %v1880_v45 }
 0x1f2   : > { %1670 = vmatpush3.bf16.msra.mxu0 %v1881_v46 }
 0x1f3   : > { %1748 = vmatprep.subr.bf16.mxu0 %v1958_v34 }
 0x295   : > { %v1742_v53 = vpop.f32.mrf.mxu0 }
 0x297   : > { %v822_v54 = vpop.f32.mrf.mxu0 }
 0x299   : > { %v1743_v55 = vpop.f32.mrf.mxu0 }
 0x29a   : > { %v854_v2 = vpack.c.bf16 %v1743_v55, %v1742_v53 }
 0x29b   : > { %v825_v56 = vpop.f32.mrf.mxu0 }
 0x29c   : > { %v853_v57 = vpack.c.bf16 %v825_v56, %v822_v54 }
 0x29d   : > { %v1746_v59 = vpop.f32.mrf.mxu0 }
 0x29e   : > { %1218 = vmatprep.mubr.bf16.mxu0 %v853_v57 }
 0x29f   : > { %v838_v60 = vpop.f32.mrf.mxu0  ;;  %1219 = vmatmul.mubr.bf16.vlgmr.msra.gmra.mxu0 %v2224_v30 }
 0x2a0   : > { %1749 = vmatpush3.bf16.msra.mxu0 %v1885_v58  ;;  %1764 = vmatprep.mubr.msk.bf16.mxu0 %vm1959_vm1, %v1958_v34 }
 0x2a1   : > { %v1747_v62 = vpop.f32.mrf.mxu0  ;;  %1750 = vmatprep.subr.bf16.mxu0 %v1958_v34 }
 0x2a2   : > { %v856_v10 = vpack.c.bf16 %v1747_v62, %v1746_v59 }
 0x2a3   : > { %v841_v63 = vpop.f32.mrf.mxu0 }
 0x2a4   : > { %v855_v0 = vpack.c.bf16 %v841_v63, %v838_v60  ;;  %1751 = vmatpush3.bf16.msra.mxu0 %v1888_v61 }
 0x2a5   : > { %1752 = vmatprep.subr.bf16.mxu0 %v1958_v34 }
 0x2a6   : > { %1259 = vmatprep.mubr.bf16.mxu1 %v855_v0 }
 0x2a7   : > { %1260 = vmatmul.mubr.bf16.vlgmr.msra.gmra.mxu1 %v854_v2 }
 0x2a8   : > { %1753 = vmatpush3.bf16.msra.mxu0 %v1890_v1 }
 0x2a9   : > { %1754 = vmatprep.subr.bf16.mxu0 %v1958_v34 }
 0x2ac   : > { %1755 = vmatpush3.bf16.msra.mxu0 %v1891_v3 }
 0x2ad   : > { %1756 = vmatprep.subr.bf16.mxu0 %v1958_v34 }
 0x2b0   : > { %1757 = vmatpush3.bf16.msra.mxu0 %v1892_v6 }
 0x2b1   : > { %1758 = vmatprep.subr.bf16.mxu0 %v1958_v34 }
 0x2b4   : > { %1759 = vmatpush3.bf16.msra.mxu0 %v1893_v7 }
 0x2b5   : > { %1760 = vmatprep.subr.bf16.mxu0 %v1958_v34 }
 0x2b8   : > { %1761 = vmatpush3.bf16.msra.mxu0 %v1894_v8 }
 0x2b9   : > { %1762 = vmatprep.subr.bf16.mxu0 %v1958_v34 }
 0x2bc   : > { %1763 = vmatpush3.bf16.msra.mxu0 %v1895_v9 }
 0x2bf   : > { %1765 = vmatmul.mubr.bf16.vlgmr.msra.gmra.mxu0 %v856_v10 }
 0x35f   : > { %v1671_v12 = vpop.f32.mrf.mxu0 }
 0x361   : > { %v1672_v14 = vpop.f32.mrf.mxu0 }
 0x362   : > { %v1673_v18 = vadd.f32 %v1672_v14, %v1671_v12 }
 0x363   : > { %v1674_v16 = vpop.f32.mrf.mxu0 }
 0x364   : > { %v1221_v34 = vadd.f32 %v1673_v18, %v1543_v19 }
 0x365   : > { %v1675_v20 = vpop.f32.mrf.mxu0 }
 0x366   : > { %v1676_v23 = vadd.f32 %v1675_v20, %v1674_v16 }
 0x367   : > { %v1693_v13 = vpop.f32.mrf.mxu1 }
 0x368   : > { %v1224_v27 = vadd.f32 %v1676_v23, %v1543_v19 }
 0x369   : > { %v1694_v15 = vpop.f32.mrf.mxu1 }
 0x36a   : > { %v1695_v21 = vadd.f32 %v1694_v15, %v1693_v13 }
 0x36b   : > { %v1696_v17 = vpop.f32.mrf.mxu1 }
 0x36c   : > { %v1262_v25 = vadd.f32 %v1695_v21, %v1221_v34 }
 0x36d   : > { %v1697_v22 = vpop.f32.mrf.mxu1 }
 0x36e   : > { %v1698_v24 = vadd.f32 %v1697_v22, %v1696_v17 }
 0x370   : > { %v1265_v30 = vadd.f32 %v1698_v24, %v1224_v27 }
 0x37f   : > { %v1302_v26 = vpop.f32.mrf.mxu0 }
 0x380   : > { %v1303_v28 = vadd.f32 %v1302_v26, %v1262_v25 }
 0x381   : > { %v1766_v29 = vpop.f32.mrf.mxu0 }
 0x382   : > { %1309 = vst [vmem:[%s205_s6] sm:$0xff] %v1303_v28 }
 0x383   : > { %v1305_v31 = vpop.f32.mrf.mxu0 }
 0x384   : > { %v1306_v32 = vadd.f32 %v1305_v31, %v1265_v30 }
 0x385   : > { %v1767_v33 = vpop.f32.mrf.mxu0 }
 0x386   : > { %1310 = vst [vmem:[%s205_s6 + $0x8] sm:$0xff] %v1306_v32 }
 0x387   : > { %1909 = shalt.err (!%p1906_p3)
}
 0x388   : > { %s1910_s22 = scalar_lea.hbm %s2351_s12, 256  ;;  %s1914_s28 = scalar_lea.hbm %s2397_s4, 512 }
 0x389   : > { %p1911_p4 = scmp.ne.s32.totalorder %s2351_s12, %s1910_s22  ;;  %p1915_p9 = scmp.lt.s32.totalorder %s2351_s12, %s2397_s4 }
 0x38a   : > { %p1916_p10 = scmp.lt.s32.totalorder %s1914_s28, %s1910_s22 }
 0x38b   : > { %p1912_p7 = pnand %p1911_p4, %p2026_p5 }
 0x38c   : > { %p1917_p11 = por %p1916_p10, %p1915_p9 }
 0x38d   : > { %p1913_p8 = pneg %p1912_p7 }
 0x38f   : > { %p1918_p12 = pnand %p1917_p11, %p1913_p8 }
 0x391   : > { %1921 = shalt.err (!%p1918_p12)
}
 0x392   : > { %s1961_s5 = smov 128   ;;  %s1962_s6 = smov 8  }
 0x393   : > { %1768 = dma.vmem_to_hbm [thread:$0]  (%p2026_p5), %s2346_s7, 256, %s2351_s12, %s2353_s13, %s1961_s5, %s1961_s5, %s1962_s6  }
 0x394 PF: > { %p1774_p13 = scmp.ge.s32.totalorder %s1956_s18, 2  ;;  %s1340_s9 = sand.u32 1, %s1944_s15  }
 0x395   : > { %s1341_s10 = scalar_lea.sflag [#allocation3], %s1340_s9 }
 0x396   : > { %p1771_p0 = pnand %p1774_p13, %p2030_p6 }
 0x398   : > { %p1772_p1 = pneg %p1771_p0 }
 0x39a   : > { %1939 = dma.done.wait (%p1772_p1), %s1341_s10, 256  }
 0x39b   : > { %1941 = vsyncadd (%p1772_p1), %s1341_s10, 4294967040  ;;  %p14_p2 = scmp.ge.s32.totalorder %s2013_s21, 4   ;;  %s2400_s15 = smov %s1948_s16 }
 0x39c   : > { %s2401_s16 = smov %s1952_s17  ;;  %s2402_s17 = smov %s2024_s24 }
 0x39d   : > { %s2403_s18 = smov %s2013_s21  ;;  %16 = sbr.rel (!%p14_p2) target bundleno = 3 (0x3), region = 76 }
 0x3a2   :  { %1346 = vsyncpa [#allocation3], 1 }
 0x3a3   :  { %1348 = vsyncpa [#allocation3 + $0x1], 1 }

</bundles_post_ra>
